<compile_context>
chip_gen: v5e
topology: v5e:2x2
jax: 0.10.0
libtpu: 0.0.40
codegen_flags: <defaults>
</compile_context>

<pallas_src>
import jax
import jax.numpy as jnp
from jax import lax
from jax.experimental import pallas as pl
from jax.experimental.pallas import tpu as pltpu


def _round_up(x, m):
    return (x + m - 1) // m * m


def _vmem_capacity_bytes():
    try:
        cap = getattr(pltpu.get_tpu_info(), "vmem_capacity_bytes", None)
        if cap:
            return int(cap)
    except Exception:
        pass
    return 64 * 1024 * 1024  # conservative fallback: v7x per-TensorCore VMEM


# ---------------------------------------------------------------------------
# Path A: small vocab, table resident in VMEM, gather as one-hot MXU matmul.
# ---------------------------------------------------------------------------
def _embed_onehot_kernel(ids_ref, table_ref, out_ref):
    # ids_ref   : (TB, 1) int32 VMEM block (this tile's token ids)
    # table_ref : (V, D) table, resident block (constant index_map)
    # out_ref   : (TB, D) output tile
    tb = out_ref.shape[0]
    v = table_ref.shape[0]
    ids = ids_ref[...]                                      # (TB, 1) int32
    cols = lax.broadcasted_iota(jnp.int32, (tb, v), 1)      # (TB, V)
    onehot = (ids == cols).astype(table_ref.dtype)          # (TB, V) exact 0/1
    out_ref[...] = jnp.dot(
        onehot, table_ref[...], preferred_element_type=jnp.float32
    ).astype(out_ref.dtype)


# ---------------------------------------------------------------------------
# Path B: large vocab, table stays in HBM; per-row DMA gather straight into
# the pipelined output block (no staging copy).
# ---------------------------------------------------------------------------
def _embed_dma_gather_kernel(ids_ref, table_hbm, out_ref, copy_sems):
    # ids_ref   : SMEM scalar-prefetch ref, shape (N_padded,)
    # table_hbm : (V, D) raw HBM ref (memory_space=pl.ANY)
    # out_ref   : (TB, D) output tile (VMEM) -- DMA destination
    # copy_sems : (TB,) DMA semaphores -> all TB row gathers kept in flight
    i = pl.program_id(0)
    tb = out_ref.shape[0]
    base = pl.multiple_of(i * tb, tb)
    # TODO(synk): cross-step pipelining (issue tile i+1's gathers before
    # waiting on tile i's) via a (2, TB, D) staging buffer would hide more of
    # the random-row HBM latency; currently we rely on the output block's
    # natural double buffering to overlap writeback with the next tile.
    copies = []
    for t in range(tb):                          # static, fully unrolled
        tok = ids_ref[base + t]                  # SMEM scalar read
        cp = pltpu.make_async_copy(
            table_hbm.at[pl.ds(tok, 1), :],
            out_ref.at[pl.ds(t, 1), :],
            copy_sems.at[t],
        )
        cp.start()
        copies.append(cp)
    for cp in copies:                            # wait on the real descriptors
        cp.wait()


_ONEHOT_MAX_VOCAB = 2048  # above this, one-hot flops/VMEM stop paying off


def word_embedding(x, table, *, block_tokens=None, force_dma_gather=False):
    """Embedding lookup: out[b, s, :] = table[x[b, s], :]."""
    B, S = x.shape
    V, D = table.shape
    itemsize = table.dtype.itemsize

    # Clamp ids for bounds safety (nn.Embedding would error on OOB ids).
    ids = jnp.clip(x.reshape(-1).astype(jnp.int32), 0, V - 1)
    N = ids.shape[0]

    # Pad the embedding dim to a lane multiple: dense (unmasked) output
    # stores and aligned row DMAs.
    d_pad = _round_up(D, 128)
    table_p = table if d_pad == D else jnp.pad(table, ((0, 0), (0, d_pad - D)))

    # Sublane packing: 8 rows/vreg for 32-bit, 16 for 16-bit dtypes.
    sub = 16 if itemsize < 4 else 8

    if block_tokens is None:
        block_tokens = 128
    block_tokens = max(sub, _round_up(min(block_tokens, _round_up(N, sub)), sub))

    vmem_cap = _vmem_capacity_bytes()
    table_bytes = V * d_pad * itemsize
    # Resident-path VMEM need: table (double-buffered by the pipeline), ids +
    # out blocks (double-buffered), the (TB, V) one-hot intermediate, slack.
    resident_need = (2 * table_bytes
                     + 4 * block_tokens * d_pad * itemsize
                     + block_tokens * max(V, 128) * 4
                     + (8 << 20))
    use_onehot = ((not force_dma_gather)
                  and V <= _ONEHOT_MAX_VOCAB
                  and resident_need <= vmem_cap - (4 << 20))

    n_pad = _round_up(N, block_tokens)
    if n_pad != N:
        ids = jnp.concatenate([ids, jnp.zeros((n_pad - N,), jnp.int32)])
    grid = (n_pad // block_tokens,)

    out_shape = jax.ShapeDtypeStruct((n_pad, d_pad), table.dtype)

    if use_onehot:
        ids2d = ids.reshape(n_pad, 1)
        grid_spec = pltpu.PrefetchScalarGridSpec(
            num_scalar_prefetch=0,
            grid=grid,
            in_specs=[
                # Per-tile ids as a VMEM block (no SMEM scalar prefetch).
                pl.BlockSpec((block_tokens, 1), lambda i: (i, 0)),
                # Whole table as one block, resident across all grid steps
                # (constant index_map -> fetched from HBM only once).
                pl.BlockSpec((V, d_pad), lambda i: (0, 0)),
            ],
            out_specs=pl.BlockSpec((block_tokens, d_pad), lambda i: (i, 0)),
        )
        out_flat = pl.pallas_call(
            _embed_onehot_kernel,
            out_shape=out_shape,
            grid_spec=grid_spec,
            compiler_params=pltpu.CompilerParams(
                dimension_semantics=("parallel",),
                vmem_limit_bytes=int(max(32 << 20,
                                         min(resident_need, vmem_cap - (4 << 20)))),
            ),
        )(ids2d, table_p)
    else:
        # TODO(synk): for very large B*S (~1e5+ tokens) the whole-array SMEM
        # scalar prefetch of ids should become a per-tile SMEM-blocked input
        # to stay within the small SMEM budget; and a resident jnp.take path
        # would keep mid-size vocab tables in VMEM on 128 MiB parts.
        dma_need = 4 * block_tokens * d_pad * itemsize + (8 << 20)
        grid_spec = pltpu.PrefetchScalarGridSpec(
            num_scalar_prefetch=1,
            grid=grid,
            in_specs=[
                pl.BlockSpec(memory_space=pl.ANY),   # table stays in HBM
            ],
            out_specs=pl.BlockSpec((block_tokens, d_pad), lambda i, ids_s: (i, 0)),
            scratch_shapes=[
                pltpu.SemaphoreType.DMA((block_tokens,)),
            ],
        )
        out_flat = pl.pallas_call(
            _embed_dma_gather_kernel,
            out_shape=out_shape,
            grid_spec=grid_spec,
            compiler_params=pltpu.CompilerParams(
                dimension_semantics=("parallel",),
                vmem_limit_bytes=int(max(32 << 20,
                                         min(dma_need, vmem_cap - (4 << 20)))),
            ),
        )(ids, table_p)

    return out_flat[:N, :D].reshape(B, S, D)


if __name__ == "__main__":
    # Small, deterministic setup consistent with the module:
    # vocab_size=64, d_model=128, batch=2, seq=8.
    vocab_size, d_model = 64, 128
    B, S = 2, 8

    key = jax.random.PRNGKey(0)
    k_tab, k_ids = jax.random.split(key)

    # nn.Embedding default init ~ N(0, 1).
    table = jax.random.normal(k_tab, (vocab_size, d_model), dtype=jnp.float32)
    x = jax.random.randint(k_ids, (B, S), 0, vocab_size, dtype=jnp.int32)

    ref = table[x]

    # Path A (resident table, one-hot MXU gather) -- default for this size.
    out_onehot = jax.block_until_ready(word_embedding(x, table))
    assert out_onehot.shape == (B, S, d_model)
    assert jnp.allclose(out_onehot, ref, rtol=1e-5, atol=1e-5), \
        "one-hot path mismatch vs reference gather"

    # Path B (HBM row-DMA gather into out block) -- forced to exercise it.
    out_dma = jax.block_until_ready(word_embedding(x, table, force_dma_gather=True))
    assert out_dma.shape == (B, S, d_model)
    assert jnp.allclose(out_dma, ref), "dma-path mismatch vs reference gather"

    print("KERNEL_OK")
</pallas_src>

<mosaic_0001>
module attributes {stable_mosaic.version = 11 : i64} {
  func.func @_embed_onehot_kernel(%arg0: i32, %arg1: memref<16x1xi32, #tpu.memory_space<vmem>>, %arg2: memref<64x128xf32, #tpu.memory_space<vmem>>, %arg3: memref<16x128xf32, #tpu.memory_space<vmem>>) attributes {dimension_semantics = [#tpu.dimension_semantics<parallel>], iteration_bounds = array<i64: 1>, scalar_prefetch = 0 : i64, scratch_operands = 0 : i64, tpu.core_type = #tpu.core_type<tc>, window_params = [{transform_indices = @transform_0, window_bounds = array<i64: 16, 1>}, {pipeline_mode = #tpu.pipeline_mode<synchronous>, transform_indices = @transform_1, window_bounds = array<i64: 64, 128>}, {transform_indices = @transform_2, window_bounds = array<i64: 16, 128>}]} {
    %c0 = arith.constant 0 : index
    %c0_0 = arith.constant 0 : index
    %0 = vector.load %arg1[%c0, %c0_0] : memref<16x1xi32, #tpu.memory_space<vmem>>, vector<16x1xi32>
    %1 = tpu.iota {dimensions = array<i32: 1>} : vector<16x64xi32>
    %2 = vector.broadcast %0 : vector<16x1xi32> to vector<16x64xi32>
    %3 = arith.cmpi eq, %2, %1 : vector<16x64xi32>
    %4 = arith.extui %3 : vector<16x64xi1> to vector<16x64xi32>
    %5 = arith.sitofp %4 : vector<16x64xi32> to vector<16x64xf32>
    %c0_1 = arith.constant 0 : index
    %c0_2 = arith.constant 0 : index
    %6 = vector.load %arg2[%c0_1, %c0_2] : memref<64x128xf32, #tpu.memory_space<vmem>>, vector<64x128xf32>
    %cst = arith.constant dense<0.000000e+00> : vector<16x128xf32>
    %7 = tpu.matmul %5, %6, %cst {dimension_numbers = #tpu.dot_dimension_numbers<[1], [0], [0], [1], [0, 0, 1, 1], [], []>} : vector<16x64xf32>, vector<64x128xf32>, vector<16x128xf32> -> vector<16x128xf32>
    %c0_3 = arith.constant 0 : index
    %c0_4 = arith.constant 0 : index
    %8 = vector.load %arg3[%c0_3, %c0_4] : memref<16x128xf32, #tpu.memory_space<vmem>>, vector<16x128xf32>
    tpu.vector_store %arg3[%c0_3, %c0_4], %7 {strides = array<i32>} : memref<16x128xf32, #tpu.memory_space<vmem>>, vector<16x128xf32>,
    return
  }
  func.func @transform_0(%arg0: i32) -> (i32, i32) {
    %c0_i32 = arith.constant 0 : i32
    %c0_i32_0 = arith.constant 0 : i32
    return %arg0, %c0_i32 : i32, i32
  }
  func.func @transform_1(%arg0: i32) -> (i32, i32) {
    %c0_i32 = arith.constant 0 : i32
    %c0_i32_0 = arith.constant 0 : i32
    %c0_i32_1 = arith.constant 0 : i32
    return %c0_i32, %c0_i32_0 : i32, i32
  }
  func.func @transform_2(%arg0: i32) -> (i32, i32) {
    %c0_i32 = arith.constant 0 : i32
    %c0_i32_0 = arith.constant 0 : i32
    return %arg0, %c0_i32 : i32, i32
  }
}

</mosaic_0001>

<bundles_post_ra>
// kernel: tpu_custom_call.1
= control target key start
LH: loop header
LB: loop body
LE: loop exit
PB: predicated region body
PF: predicated region fallthrough
CT: control target
= control target key end

     0   :  { %7 = vsyncpa [#allocation3], 0  ;;  %s213_s0 = inlined_call_operand.vmem [shape: s32[16,1], index: 0, kind: input, shape index: {}]   ;;  %s214_s1 = inlined_call_operand.hbm [shape: f32[64,128], index: 1, kind: input, shape index: {}]   ;;  %s215_s2 = inlined_call_operand.hbm [shape: f32[16,128], index: 2, kind: output, shape index: {}]  }
   0x1   :  { %8 = vsyncpa [#allocation4], 0  ;;  %s15_s11 = sshll.u32 %s214_s1, 4  ;;  %s174_s12 = smov [#allocation2]   ;;  %s16_s11 = int_to_ptr.hbm [resolvable:$true] %s15_s11 }
   0x2   :  { %s17_s13 = sshll.u32 %s174_s12, 4  ;;  %s175_s14 = smov 128   ;;  %s18_s13 = int_to_ptr.vmem [resolvable:$true] %s17_s13 }
   0x3   :  { %s176_s15 = smov 8  }
   0x4   :  { %23 = dma.hbm_to_vmem [thread:$0]  %s16_s11, 1024, %s18_s13, [#allocation3], %s175_s14, %s175_s14, %s176_s15  }
   0x5   :  { %170 = dma.done.wait [#allocation3], 1024  }
   0x6   :  { %171 = vsyncadd [#allocation3], 4294966272  ;;  %v177_v0 = vmov 0   ;;  %v28_v1 = vld [vmem:[%s213_s0] sm:$0xff]  ;;  %v51_v2 = vld [vmem:[#allocation2 + $0x38] sm:$0xff]  ;;  %v30_v11 = vlaneseq  ;;  %vm52_vm0 = vcmask 523264  }
   0x7   :  { %121 = vset.pattern.permute.xlu0 %v177_v0  ;;  %67 = vmatpush.msra.mxu0 %v51_v2  ;;  %v50_v3 = vld [vmem:[#allocation2 + $0x30] sm:$0xff]  ;;  %v49_v4 = vld [vmem:[#allocation2 + $0x28] sm:$0xff]  ;;  %v48_v5 = vld [vmem:[#allocation2 + $0x20] sm:$0xff]  ;;  %v178_v14 = vmov 0.0   ;;  %s90_s22 = sshll.u32 %s215_s2, 4  ;;  %s91_s22 = int_to_ptr.hbm [resolvable:$true] %s90_s22 }
   0x8   :  { %33 = vperm.xlu0 %121, %v28_v1   ;;  %107 = vmatpush.msra.mxu1 %v51_v2  ;;  %v29_v6 = vld [vmem:[%s213_s0 + $0x8] sm:$0xff]  ;;  %v47_v7 = vld [vmem:[#allocation2 + $0x18] sm:$0xff]  ;;  %v46_v8 = vld [vmem:[#allocation2 + $0x10] sm:$0xff]  ;;  %v31_v12 = vand.u32 127, %v30_v11  ;;  %s179_s0 = smov [#allocation5]  }
   0x9   :  { %68 = vmatpush.msra.mxu0 %v50_v3  ;;  %v45_v9 = vld [vmem:[#allocation2 + $0x8] sm:$0xff]  ;;  %v44_v10 = vld [vmem:[#allocation2] sm:$0xff]  ;;  %s88_s19 = sshll.u32 %s179_s0, 4  ;;  %s89_s19 = int_to_ptr.vmem [resolvable:$true] %s88_s19 }
   0xa   :  { %108 = vmatpush.msra.mxu1 %v50_v3 }
   0xb   :  { %69 = vmatpush.msra.mxu0 %v49_v4 }
   0xc   :  { %109 = vmatpush.msra.mxu1 %v49_v4 }
   0xd   :  { %70 = vmatpush.msra.mxu0 %v48_v5 }
   0xe   :  { %110 = vmatpush.msra.mxu1 %v48_v5 }
   0xf   :  { %71 = vmatpush.msra.mxu0 %v47_v7 }
  0x10   :  { %36 = vperm.xlu0 %121, %v29_v6   ;;  %111 = vmatpush.msra.mxu1 %v47_v7 }
  0x11   :  { %72 = vmatpush.msra.mxu0 %v46_v8 }
  0x12   :  { %112 = vmatpush.msra.mxu1 %v46_v8 }
  0x13   :  { %73 = vmatpush.msra.mxu0 %v45_v9 }
  0x14   :  { %113 = vmatpush.msra.mxu1 %v45_v9 }
  0x15   :  { %74 = vmatpush.msra.mxu0 %v44_v10 }
  0x16   :  { %114 = vmatpush.msra.mxu1 %v44_v10 }
  0x7a   :  { %v34_v13 = vpop.permute.xlu0 %33 }
  0x7b   :  { %vm38_vm1 = vcmp.eq.s32.totalorder %v34_v13, %v31_v12 }
  0x7c   :  { %v103_v15 = vsel %vm38_vm1, 1.0, %v178_v14 }
  0x7d   :  { %105 = vmatmul.msk.f32.vlgmr.msra.gmra.mxu0 %vm52_vm0, %v103_v15 }
  0x82   :  { %v37_v16 = vpop.permute.xlu0 %36 }
  0x83   :  { %vm39_vm2 = vcmp.eq.s32.totalorder %v37_v16, %v31_v12 }
  0x84   :  { %v104_v17 = vsel %vm39_vm2, 1.0, %v178_v14 }
  0x85   :  { %106 = vmatmul.msk.f32.vlgmr.msra.gmra.mxu1 %vm52_vm0, %v104_v17 }
  0xfa   :  { %v76_v18 = vpop.f32.mrf.mxu0 }
  0xfb   :  { %82 = vst [vmem:[#allocation5] sm:$0xff] %v76_v18 }
 0x102   :  { %v79_v19 = vpop.f32.mrf.mxu1 }
 0x103   :  { %83 = vst [vmem:[#allocation5 + $0x8] sm:$0xff] %v79_v19 }
 0x104   :  { %96 = dma.vmem_to_hbm [thread:$0]  %s89_s19, 256, %s91_s22, [#allocation4], %s175_s14, %s175_s14, %s176_s15  }
 0x105   :  { %172 = dma.done.wait [#allocation4], 256  }
 0x106   :  { %173 = vsyncadd [#allocation4], 4294967040 }
 0x107   :  { %101 = vsyncpa [#allocation3], 1 }
 0x108   :  { %102 = vsyncpa [#allocation4], 1 }

</bundles_post_ra>
